<compile_context>
chip_gen: v7x
topology: tpu7x:2x2x1
jax: 0.10.0
libtpu: 0.0.40
codegen_flags: <defaults>
</compile_context>

<pallas_src>
import functools

import jax
import jax.numpy as jnp
from jax.experimental import pallas as pl
from jax.experimental.pallas import tpu as pltpu


def _round_up(n, m):
    return ((n + m - 1) // m) * m


def attention_head_kernel(x_ref, w_ref, out_ref, obj_ref, qkv_ref, *, t_valid):
    # x_ref:   [T_pad, C_pad]      (bf16, zero padded)
    # w_ref:   [C_pad, 3*H_pad]    (bf16, fused [K | Q*scale | V], zero padded)
    # out_ref: [TQ, H_pad]         per-q-tile output block (f32)
    # obj_ref: [1, T_pad]          pre-softmax affinities row 1 (lane-dense, f32)
    # qkv_ref: [T_pad, 3*H_pad]    bf16 VMEM scratch, persists across grid steps
    i = pl.program_id(0)
    tq, h_pad = out_ref.shape

    # Fused QKV projection for the whole (padded) sequence, computed once.
    @pl.when(i == 0)
    def _():
        qkv_ref[...] = jnp.dot(
            x_ref[...], w_ref[...],
            preferred_element_type=jnp.float32).astype(qkv_ref.dtype)

    k = qkv_ref[:, 0:h_pad]                 # [T_pad, H_pad]  bf16
    v = qkv_ref[:, 2 * h_pad:3 * h_pad]     # [T_pad, H_pad]  bf16

    row0 = pl.multiple_of(i * tq, tq)
    q = qkv_ref[pl.ds(row0, tq), h_pad:2 * h_pad]   # [TQ, H_pad]  bf16

    # affinities = q @ k.T  (scale already folded into the Q weight block);
    # contract the head dim directly, no transpose materialized.
    aff = jax.lax.dot_general(
        q, k, (((1,), (1,)), ((), ())),
        preferred_element_type=jnp.float32)                   # [TQ, T_pad]

    # obj_affinities = affinities[1:2, :] (pre-softmax); global row 1 is in tile 0.
    @pl.when(i == 0)
    def _():
        obj_ref[...] = aff[1:2, :].astype(obj_ref.dtype)

    # Mask padded key columns, softmax along the key axis.
    col = jax.lax.broadcasted_iota(jnp.int32, aff.shape, 1)
    aff = jnp.where(col < t_valid, aff, -jnp.inf)
    m = jnp.max(aff, axis=-1, keepdims=True)
    p = jnp.exp(aff - m)
    denom = jnp.sum(p, axis=-1, keepdims=True)
    attn = p * pl.reciprocal(denom, approx=True)

    # TODO(synk): training-mode dropout would be applied to `attn` here.
    out_ref[...] = jnp.dot(attn.astype(jnp.bfloat16), v,
                           preferred_element_type=jnp.float32).astype(out_ref.dtype)


def fuse_qkv_weights(w_k, w_q, w_v, c_pad, h_pad):
    """Build the fused, padded, bf16 QKV weight [C_pad, 3*H_pad].

    PyTorch Linear weights are [H, C]. The head_size**-0.5 scale is folded into
    the Q block. In a real model this runs ONCE at init, not per forward call.
    """
    h, c = w_k.shape
    scale = jnp.float32(h) ** jnp.float32(-0.5)   # k.shape[-1] ** -0.5

    def pad_t(w):  # [H, C] -> [C_pad, H_pad]
        return jnp.pad(w.T, ((0, c_pad - c), (0, h_pad - h)))

    fused = jnp.concatenate([pad_t(w_k), pad_t(w_q * scale), pad_t(w_v)], axis=1)
    return fused.astype(jnp.bfloat16)


def attention_head(x, w_k, w_q, w_v, *, tq=128):
    """x: [T, C]; w_{k,q,v}: PyTorch-convention Linear weights [H, C]."""
    t, c = x.shape
    h = w_k.shape[0]

    t_pad = _round_up(max(t, 8), 128)   # lane-dense key axis / obj output
    c_pad = _round_up(c, 128)
    h_pad = _round_up(h, 128)
    tq = min(tq, t_pad)
    assert t_pad % tq == 0 and tq >= 2  # row 1 (obj) must live in q-tile 0

    # One-time (init-style) weight fusion; per-call zero pad + bf16 cast of x.
    w_qkv = fuse_qkv_weights(w_k, w_q, w_v, c_pad, h_pad)
    x_p = jnp.pad(x, ((0, t_pad - t), (0, c_pad - c))).astype(jnp.bfloat16)

    kernel = functools.partial(attention_head_kernel, t_valid=t)

    out_p, obj_p = pl.pallas_call(
        kernel,
        grid=(t_pad // tq,),
        in_specs=[
            pl.BlockSpec((t_pad, c_pad), lambda i: (0, 0)),       # x (resident)
            pl.BlockSpec((c_pad, 3 * h_pad), lambda i: (0, 0)),   # fused weight
        ],
        out_specs=(
            pl.BlockSpec((tq, h_pad), lambda i: (i, 0)),          # out per q-tile
            pl.BlockSpec((1, t_pad), lambda i: (0, 0)),           # obj row
        ),
        out_shape=(
            jax.ShapeDtypeStruct((t_pad, h_pad), jnp.float32),
            jax.ShapeDtypeStruct((1, t_pad), jnp.float32),
        ),
        scratch_shapes=[pltpu.VMEM((t_pad, 3 * h_pad), jnp.bfloat16)],
        compiler_params=pltpu.CompilerParams(
            # q-tile axis kept "arbitrary": the fused-QKV scratch and the obj
            # output block are grid-invariant. TODO(synk): for v7x megacore,
            # split the projection into its own call and mark this "parallel".
            dimension_semantics=("arbitrary",)),
    )(x_p, w_qkv)

    return out_p[:t, :h], obj_p[:, :t]


def attention_head_ref(x, w_k, w_q, w_v):
    """Pure-JAX (f32) reference mirroring the PyTorch forward (eval-mode dropout)."""
    k = x @ w_k.T
    q = x @ w_q.T
    v = x @ w_v.T
    aff = (q @ k.T) * (k.shape[-1] ** -0.5)
    obj = aff[1:2, :]
    aff = jax.nn.softmax(aff, axis=-1)
    return aff @ v, obj


if __name__ == "__main__":
    # Small shapes consistent with the module: seq T=8, n_embd C=32, head_size H=16.
    T, C, H = 8, 32, 16
    key = jax.random.PRNGKey(0)
    kx, kk, kq, kv = jax.random.split(key, 4)

    x = jax.random.normal(kx, (T, C), dtype=jnp.float32)
    bound = 1.0 / (C ** 0.5)
    w_k = jax.random.uniform(kk, (H, C), jnp.float32, -bound, bound)
    w_q = jax.random.uniform(kq, (H, C), jnp.float32, -bound, bound)
    w_v = jax.random.uniform(kv, (H, C), jnp.float32, -bound, bound)

    out, obj = attention_head(x, w_k, w_q, w_v)
    out = jax.block_until_ready(out)
    obj = jax.block_until_ready(obj)

    out_ref, obj_ref = attention_head_ref(x, w_k, w_q, w_v)
    assert out.shape == (T, H) and obj.shape == (1, T)
    # bf16 MXU inputs (f32 accumulation) -> loosened tolerances vs. the f32 reference.
    assert jnp.allclose(out, out_ref, atol=5e-2, rtol=5e-2)
    assert jnp.allclose(obj, obj_ref, atol=5e-2, rtol=5e-2)

    print("KERNEL_OK")
</pallas_src>

<mosaic_0001>
module attributes {stable_mosaic.version = 11 : i64} {
  func.func @attention_head_kernel(%arg0: i32, %arg1: memref<128x128xbf16, #tpu.memory_space<vmem>>, %arg2: memref<128x384xbf16, #tpu.memory_space<vmem>>, %arg3: memref<128x128xf32, #tpu.memory_space<vmem>>, %arg4: memref<1x128xf32, #tpu.memory_space<vmem>>, %arg5: memref<128x384xbf16, #tpu.memory_space<vmem>>) attributes {dimension_semantics = [#tpu.dimension_semantics<arbitrary>], iteration_bounds = array<i64: 1>, scalar_prefetch = 0 : i64, scratch_operands = 1 : i64, tpu.core_type = #tpu.core_type<tc>, window_params = [{pipeline_mode = #tpu.pipeline_mode<synchronous>, transform_indices = @transform_0, window_bounds = array<i64: 128, 128>}, {pipeline_mode = #tpu.pipeline_mode<synchronous>, transform_indices = @transform_1, window_bounds = array<i64: 128, 384>}, {transform_indices = @transform_2, window_bounds = array<i64: 128, 128>}, {pipeline_mode = #tpu.pipeline_mode<synchronous>, transform_indices = @transform_3, window_bounds = array<i64: 1, 128>}]} {
    %c0_i32 = arith.constant 0 : i32
    %0 = arith.cmpi eq, %arg0, %c0_i32 : i32
    %1 = arith.extui %0 : i1 to i32
    %c0_i32_0 = arith.constant 0 : i32
    %2 = arith.cmpi ne, %1, %c0_i32_0 : i32
    scf.if %2 {
      %c0_11 = arith.constant 0 : index
      %c0_12 = arith.constant 0 : index
      %31 = vector.load %arg1[%c0_11, %c0_12] : memref<128x128xbf16, #tpu.memory_space<vmem>>, vector<128x128xbf16>
      %c0_13 = arith.constant 0 : index
      %c0_14 = arith.constant 0 : index
      %32 = vector.load %arg2[%c0_13, %c0_14] : memref<128x384xbf16, #tpu.memory_space<vmem>>, vector<128x384xbf16>
      %cst_15 = arith.constant dense<0.000000e+00> : vector<128x384xf32>
      %33 = tpu.matmul %31, %32, %cst_15 {dimension_numbers = #tpu.dot_dimension_numbers<[1], [0], [0], [1], [0, 0, 1, 1], [], []>} : vector<128x128xbf16>, vector<128x384xbf16>, vector<128x384xf32> -> vector<128x384xf32>
      %34 = arith.truncf %33 : vector<128x384xf32> to vector<128x384xbf16>
      %c0_16 = arith.constant 0 : index
      %c0_17 = arith.constant 0 : index
      %35 = vector.load %arg5[%c0_16, %c0_17] : memref<128x384xbf16, #tpu.memory_space<vmem>>, vector<128x384xbf16>
      tpu.vector_store %arg5[%c0_16, %c0_17], %34 {strides = array<i32>} : memref<128x384xbf16, #tpu.memory_space<vmem>>, vector<128x384xbf16>,
    } else {
    }
    %c0 = arith.constant 0 : index
    %c0_1 = arith.constant 0 : index
    %3 = vector.load %arg5[%c0, %c0_1] : memref<128x384xbf16, #tpu.memory_space<vmem>>, vector<128x128xbf16>
    %c0_2 = arith.constant 0 : index
    %c256 = arith.constant 256 : index
    %4 = vector.load %arg5[%c0_2, %c256] : memref<128x384xbf16, #tpu.memory_space<vmem>>, vector<128x128xbf16>
    %c128_i32 = arith.constant 128 : i32
    %5 = arith.muli %arg0, %c128_i32 : i32
    %6 = tpu.assume_multiple %5, 128 : i32
    %7 = arith.index_cast %6 : i32 to index
    %c128 = arith.constant 128 : index
    %8 = vector.load %arg5[%7, %c128] : memref<128x384xbf16, #tpu.memory_space<vmem>>, vector<128x128xbf16>
    %cst = arith.constant dense<0.000000e+00> : vector<128x128xf32>
    %9 = tpu.matmul %8, %3, %cst {dimension_numbers = #tpu.dot_dimension_numbers<[1], [1], [0], [0], [0, 0, 1, 0], [], []>} : vector<128x128xbf16>, vector<128x128xbf16>, vector<128x128xf32> -> vector<128x128xf32>
    %c0_i32_3 = arith.constant 0 : i32
    %10 = arith.cmpi eq, %arg0, %c0_i32_3 : i32
    %11 = arith.extui %10 : i1 to i32
    %c0_i32_4 = arith.constant 0 : i32
    %12 = arith.cmpi ne, %11, %c0_i32_4 : i32
    scf.if %12 {
      %31 = vector.extract_strided_slice %9 {offsets = [1, 0], sizes = [1, 128], strides = [1, 1]} : vector<128x128xf32> to vector<1x128xf32>
      %c0_11 = arith.constant 0 : index
      %c0_12 = arith.constant 0 : index
      %32 = vector.load %arg4[%c0_11, %c0_12] : memref<1x128xf32, #tpu.memory_space<vmem>>, vector<1x128xf32>
      tpu.vector_store %arg4[%c0_11, %c0_12], %31 {strides = array<i32>} : memref<1x128xf32, #tpu.memory_space<vmem>>, vector<1x128xf32>,
    } else {
    }
    %13 = tpu.iota {dimensions = array<i32: 1>} : vector<128x128xi32>
    %c8_i32 = arith.constant 8 : i32
    %14 = vector.broadcast %c8_i32 : i32 to vector<128x128xi32>
    %15 = arith.cmpi slt, %13, %14 : vector<128x128xi32>
    %cst_5 = arith.constant 0xFF800000 : f32
    %16 = vector.broadcast %cst_5 : f32 to vector<128x128xf32>
    %17 = arith.select %15, %9, %16 : vector<128x128xi1>, vector<128x128xf32>
    %cst_6 = arith.constant dense<0xFF800000> : vector<128xf32>
    %18 = vector.multi_reduction <maximumf>, %17, %cst_6 [1] : vector<128x128xf32> to vector<128xf32>
    %19 = vector.shape_cast %18 : vector<128xf32> to vector<128x1xf32>
    %20 = vector.broadcast %19 : vector<128x1xf32> to vector<128x128xf32>
    %21 = arith.subf %17, %20 : vector<128x128xf32>
    %22 = math.exp %21 : vector<128x128xf32>
    %cst_7 = arith.constant dense<0.000000e+00> : vector<128xf32>
    %23 = vector.multi_reduction <add>, %22, %cst_7 [1] : vector<128x128xf32> to vector<128xf32>
    %24 = vector.shape_cast %23 : vector<128xf32> to vector<128x1xf32>
    %25 = tpu.reciprocal %24 {approx = true} : vector<128x1xf32> -> vector<128x1xf32>
    %26 = vector.broadcast %25 : vector<128x1xf32> to vector<128x128xf32>
    %27 = arith.mulf %22, %26 : vector<128x128xf32>
    %28 = arith.truncf %27 : vector<128x128xf32> to vector<128x128xbf16>
    %cst_8 = arith.constant dense<0.000000e+00> : vector<128x128xf32>
    %29 = tpu.matmul %28, %4, %cst_8 {dimension_numbers = #tpu.dot_dimension_numbers<[1], [0], [0], [1], [0, 0, 1, 1], [], []>} : vector<128x128xbf16>, vector<128x128xbf16>, vector<128x128xf32> -> vector<128x128xf32>
    %c0_9 = arith.constant 0 : index
    %c0_10 = arith.constant 0 : index
    %30 = vector.load %arg3[%c0_9, %c0_10] : memref<128x128xf32, #tpu.memory_space<vmem>>, vector<128x128xf32>
    tpu.vector_store %arg3[%c0_9, %c0_10], %29 {strides = array<i32>} : memref<128x128xf32, #tpu.memory_space<vmem>>, vector<128x128xf32>,
    return
  }
  func.func @transform_0(%arg0: i32) -> (i32, i32) {
    %c0_i32 = arith.constant 0 : i32
    %c0_i32_0 = arith.constant 0 : i32
    %c0_i32_1 = arith.constant 0 : i32
    return %c0_i32, %c0_i32_0 : i32, i32
  }
  func.func @transform_1(%arg0: i32) -> (i32, i32) {
    %c0_i32 = arith.constant 0 : i32
    %c0_i32_0 = arith.constant 0 : i32
    %c0_i32_1 = arith.constant 0 : i32
    return %c0_i32, %c0_i32_0 : i32, i32
  }
  func.func @transform_2(%arg0: i32) -> (i32, i32) {
    %c0_i32 = arith.constant 0 : i32
    %c0_i32_0 = arith.constant 0 : i32
    return %arg0, %c0_i32 : i32, i32
  }
  func.func @transform_3(%arg0: i32) -> (i32, i32) {
    %c0_i32 = arith.constant 0 : i32
    %c0_i32_0 = arith.constant 0 : i32
    %c0_i32_1 = arith.constant 0 : i32
    return %c0_i32, %c0_i32_0 : i32, i32
  }
}

</mosaic_0001>

<bundles_post_ra>
// kernel: tpu_custom_call.1
= control target key start
LH: loop header
LB: loop body
LE: loop exit
PB: predicated region body
PF: predicated region fallthrough
CT: control target
= control target key end

     0   :  { %9 = vsyncpa [#allocation4], 0  ;;  %s1593_s0 = inlined_call_operand.hbm [shape: bf16[128,128], index: 0, kind: input, shape index: {}]   ;;  %s1594_s1 = inlined_call_operand.hbm [shape: bf16[128,384], index: 1, kind: input, shape index: {}]   ;;  %s1595_s2 = inlined_call_operand.hbm [shape: f32[128,128], index: 2, kind: output, shape index: {0}]   ;;  %s1596_s3 = inlined_call_operand.hbm [shape: f32[1,128], index: 3, kind: output, shape index: {1}]  }
   0x1   :  { %10 = vsyncpa [#allocation7], 0 }
   0x2   :  { %11 = vsyncpa [#allocation5], 0 }
   0x3   :  { %12 = vsyncpa [#allocation10], 0  ;;  %s1366_s12 = smov [#allocation3]   ;;  %s1270_s16 = scalar_lea.hbm %s1593_s0, 1024 }
   0x4   :  { %s18_s13 = sshll.u32 %s1366_s12, 4  ;;  %p1271_p0 = scmp.ne.s32.totalorder %s1593_s0, %s1270_s16  ;;  %s19_s13 = int_to_ptr.vmem [resolvable:$true] %s18_s13 }
   0x5   :  { %p1274_p1 = scmp.lt.u32.totalorder %s1270_s16, %s1593_s0 }
   0x7   :  { %p1276_p2 = pnand %p1274_p1, %p1271_p0 }
   0x9   :  { %1279 = shalt.err (!%p1276_p2)
}
   0xa   :  { %s1280_s21 = scalar_lea.vmem %s19_s13, 1024  ;;  %p1285_p4 = scmp.lt.s32.totalorder %s19_s13, %s19_s13 }
   0xb   :  { %p1281_p3 = scmp.ne.s32.totalorder %s19_s13, %s1280_s21  ;;  %p1286_p5 = scmp.lt.s32.totalorder %s1280_s21, %s1280_s21 }
   0xd   :  { %p1287_p6 = por %p1286_p5, %p1285_p4 }
   0xf   :  { %p1288_p7 = pnand %p1287_p6, %p1281_p3 }
  0x11   :  { %1291 = shalt.err (!%p1288_p7)
}
  0x12   :  { %s1367_s22 = smov 64   ;;  %s1368_s23 = smov 4  }
  0x13   :  { %24 = dma.hbm_to_vmem [thread:$0]  %s1593_s0, 1024, %s19_s13, [#allocation4], %s1367_s22, %s1367_s22, %s1368_s23  }
  0x14   :  { %s1369_s26 = smov [#allocation6]   ;;  %s1292_s30 = scalar_lea.hbm %s1594_s1, 3072 }
  0x15   :  { %s30_s27 = sshll.u32 %s1369_s26, 4  ;;  %p1293_p8 = scmp.ne.s32.totalorder %s1594_s1, %s1292_s30  ;;  %s31_s27 = int_to_ptr.vmem [resolvable:$true] %s30_s27 }
  0x16   :  { %p1296_p9 = scmp.lt.u32.totalorder %s1292_s30, %s1594_s1 }
  0x18   :  { %p1298_p10 = pnand %p1296_p9, %p1293_p8 }
  0x1a   :  { %1301 = shalt.err (!%p1298_p10)
}
  0x1b   :  { %s1302_s8 = scalar_lea.vmem %s31_s27, 3072  ;;  %p1307_p12 = scmp.lt.s32.totalorder %s31_s27, %s31_s27 }
  0x1c   :  { %p1303_p11 = scmp.ne.s32.totalorder %s31_s27, %s1302_s8  ;;  %p1308_p13 = scmp.lt.s32.totalorder %s1302_s8, %s1302_s8 }
  0x1e   :  { %p1309_p0 = por %p1308_p13, %p1307_p12 }
  0x20   :  { %p1310_p1 = pnand %p1309_p0, %p1303_p11 }
  0x22   :  { %1313 = shalt.err (!%p1310_p1)
}
  0x23   :  { %s1370_s0 = smov 192   ;;  %s1371_s9 = smov 12  }
  0x24   :  { %36 = dma.hbm_to_vmem [thread:$0]  %s1594_s1, 3072, %s31_s27, [#allocation7], %s1370_s0, %s1370_s0, %s1371_s9  }
  0x25   :  { %1358 = dma.done.wait [#allocation4], 1024  }
  0x26   :  { %1359 = vsyncadd [#allocation4], 4294966272 }
  0x27   :  { %1360 = dma.done.wait [#allocation7], 3072  }
  0x28   :  { %1361 = vsyncadd [#allocation7], 4294964224  ;;  %v1372_v0 = vmov 0   ;;  %v1166_v1 = vld [vmem:[#allocation6 + $0x4] ss:$12 sps:$4 sm:$0xff]   ;;  %v1421_v18 = vld [vmem:[#allocation3 + $0x8] sm:$0xff]  }
  0x29   :  { %304 = vmatprep.mubr.bf16.mxu0 %v1372_v0  ;;  %v1168_v2 = vld [vmem:[#allocation6] ss:$12 sps:$4 sm:$0xff]   ;;  %272 = vmatprep.subr.bf16.mxu0 %v1166_v1  ;;  %v1169_v3 = vld [vmem:[#allocation6 + $0x1c] ss:$12 sps:$4 sm:$0xff]   ;;  %v1171_v4 = vld [vmem:[#allocation6 + $0x18] ss:$12 sps:$4 sm:$0xff]  }
  0x2a   :  { %273 = vmatpush1.bf16.msra.mxu0 %v1168_v2  ;;  %v1172_v5 = vld [vmem:[#allocation6 + $0x34] ss:$12 sps:$4 sm:$0xff]   ;;  %v1174_v6 = vld [vmem:[#allocation6 + $0x30] ss:$12 sps:$4 sm:$0xff]   ;;  %v1175_v7 = vld [vmem:[#allocation6 + $0x4c] ss:$12 sps:$4 sm:$0xff]  }
  0x2b   :  { %274 = vmatprep.subr.bf16.mxu0 %v1169_v3  ;;  %v1177_v8 = vld [vmem:[#allocation6 + $0x48] ss:$12 sps:$4 sm:$0xff]   ;;  %v1190_v9 = vld [vmem:[#allocation3] sm:$0xff]   ;;  %v1186_v15 = vld [vmem:[#allocation6 + $0x90] ss:$12 sps:$4 sm:$0xff]   ;;  %s1373_s1 = smov [#allocation9]  }
  0x2c   :  { %v1178_v10 = vld [vmem:[#allocation6 + $0x64] ss:$12 sps:$4 sm:$0xff]   ;;  %1075 = vmatprep.mubr.bf16.mxu1 %v1190_v9  ;;  %v1180_v11 = vld [vmem:[#allocation6 + $0x60] ss:$12 sps:$4 sm:$0xff]   ;;  %v1181_v12 = vld [vmem:[#allocation6 + $0x7c] ss:$12 sps:$4 sm:$0xff]  }
  0x2d   :  { %v1183_v13 = vld [vmem:[#allocation6 + $0x78] ss:$12 sps:$4 sm:$0xff]   ;;  %v1184_v14 = vld [vmem:[#allocation6 + $0x94] ss:$12 sps:$4 sm:$0xff]   ;;  %v1433_v22 = vld [vmem:[#allocation3 + $0x28] sm:$0xff]   ;;  %s963_s12 = sshll.u32 %s1373_s1, 4  ;;  %s964_s12 = int_to_ptr.vmem [resolvable:$true] %s963_s12 }
  0x2e   :  { %275 = vmatpush1.bf16.msra.mxu0 %v1171_v4  ;;  %v1187_v16 = vld [vmem:[#allocation6 + $0xac] ss:$12 sps:$4 sm:$0xff]   ;;  %v1189_v17 = vld [vmem:[#allocation6 + $0xa8] ss:$12 sps:$4 sm:$0xff]   ;;  %v1430_v21 = vld [vmem:[#allocation3 + $0x20] sm:$0xff]   ;;  %s1314_s13 = scalar_lea.vmem %s964_s12, 16  ;;  %p1319_p3 = scmp.lt.s32.totalorder %s964_s12, %s964_s12 }
  0x2f   :  { %276 = vmatprep.subr.bf16.mxu0 %v1172_v5  ;;  %v1424_v19 = vld [vmem:[#allocation3 + $0x10] sm:$0xff]   ;;  %v1427_v20 = vld [vmem:[#allocation3 + $0x18] sm:$0xff]   ;;  %p1315_p2 = scmp.ne.s32.totalorder %s964_s12, %s1314_s13  ;;  %s1318_s14 = scalar_lea.vmem %s964_s12, 32 }
  0x30   :  { %v1436_v23 = vld [vmem:[#allocation3 + $0x30] sm:$0xff]   ;;  %v1439_v24 = vld [vmem:[#allocation3 + $0x38] sm:$0xff]   ;;  %p1320_p4 = scmp.lt.s32.totalorder %s1318_s14, %s1314_s13 }
  0x32   :  { %277 = vmatpush1.bf16.msra.mxu0 %v1174_v6  ;;  %p1321_p5 = por %p1320_p4, %p1319_p3 }
  0x33   :  { %278 = vmatprep.subr.bf16.mxu0 %v1175_v7 }
  0x34   :  { %p1322_p6 = pnand %p1321_p5, %p1315_p2 }
  0x36   :  { %279 = vmatpush1.bf16.msra.mxu0 %v1177_v8 }
  0x37   :  { %280 = vmatprep.subr.bf16.mxu0 %v1178_v10  ;;  %v1199_v10 = vld [vmem:[#allocation6 + $0x20] ss:$12 sps:$4 sm:$0xff]  }
  0x3a   :  { %281 = vmatpush1.bf16.msra.mxu0 %v1180_v11  ;;  %v1200_v11 = vld [vmem:[#allocation6 + $0x38] ss:$12 sps:$4 sm:$0xff]  }
  0x3b   :  { %282 = vmatprep.subr.bf16.mxu0 %v1181_v12  ;;  %v1201_v12 = vld [vmem:[#allocation6 + $0x50] ss:$12 sps:$4 sm:$0xff]  }
  0x3e   :  { %283 = vmatpush1.bf16.msra.mxu0 %v1183_v13  ;;  %v1202_v13 = vld [vmem:[#allocation6 + $0x68] ss:$12 sps:$4 sm:$0xff]  }
  0x3f   :  { %284 = vmatprep.subr.bf16.mxu0 %v1184_v14  ;;  %v1203_v14 = vld [vmem:[#allocation6 + $0x80] ss:$12 sps:$4 sm:$0xff]  }
  0x42   :  { %285 = vmatpush1.bf16.msra.mxu0 %v1186_v15  ;;  %v1204_v15 = vld [vmem:[#allocation6 + $0x98] ss:$12 sps:$4 sm:$0xff]  }
  0x43   :  { %286 = vmatprep.subr.bf16.mxu0 %v1187_v16  ;;  %v1205_v16 = vld [vmem:[#allocation6 + $0xb0] ss:$12 sps:$4 sm:$0xff]  }
  0x46   :  { %287 = vmatpush1.bf16.msra.mxu0 %v1189_v17  ;;  %v661_v17 = vlaneseq }
  0x49   :  { %305 = vmatmul.mubr.bf16.vlgmr.msra.gmra.mrb[0].mxu0 %v1190_v9  ;;  %v1198_v9 = vld [vmem:[#allocation6 + $0x8] ss:$12 sps:$4 sm:$0xff]  }
  0x4a   :  { %314 = vmatprep.mubr.bf16.mxu0 %v1372_v0  ;;  %1059 = vmatprep.subr.bf16.mxu1 %v1198_v9 }
  0x4b   :  { %1060 = vmatpush3.bf16.msra.mxu1 %v1198_v9 }
  0x4c   :  { %1061 = vmatprep.subr.bf16.mxu1 %v1199_v10 }
  0x4f   :  { %1062 = vmatpush3.bf16.msra.mxu1 %v1199_v10 }
  0x50   :  { %1063 = vmatprep.subr.bf16.mxu1 %v1200_v11 }
  0x51   :  { %315 = vmatmul.mubr.bf16.gmra.mrb[4].mxu0 %v1421_v18 }
  0x52   :  { %324 = vmatprep.mubr.bf16.mxu0 %v1372_v0 }
  0x53   :  { %1064 = vmatpush3.bf16.msra.mxu1 %v1200_v11 }
  0x54   :  { %1065 = vmatprep.subr.bf16.mxu1 %v1201_v12 }
  0x57   :  { %1066 = vmatpush3.bf16.msra.mxu1 %v1201_v12 }
  0x58   :  { %1067 = vmatprep.subr.bf16.mxu1 %v1202_v13 }
  0x59   :  { %325 = vmatmul.mubr.bf16.gmra.mrb[8].mxu0 %v1424_v19 }
  0x5a   :  { %334 = vmatprep.mubr.bf16.mxu0 %v1372_v0 }
  0x5b   :  { %1068 = vmatpush3.bf16.msra.mxu1 %v1202_v13 }
  0x5c   :  { %1069 = vmatprep.subr.bf16.mxu1 %v1203_v14 }
  0x5f   :  { %1070 = vmatpush3.bf16.msra.mxu1 %v1203_v14 }
  0x60   :  { %1071 = vmatprep.subr.bf16.mxu1 %v1204_v15 }
  0x61   :  { %335 = vmatmul.mubr.bf16.gmra.mrb[12].mxu0 %v1427_v20 }
  0x62   :  { %344 = vmatprep.mubr.bf16.mxu0 %v1372_v0 }
  0x63   :  { %1072 = vmatpush3.bf16.msra.mxu1 %v1204_v15 }
  0x64   :  { %1073 = vmatprep.subr.bf16.mxu1 %v1205_v16 }
  0x67   :  { %1074 = vmatpush3.bf16.msra.mxu1 %v1205_v16 }
  0x69   :  { %345 = vmatmul.mubr.bf16.gmra.mrb[16].mxu0 %v1430_v21 }
  0x6a   :  { %354 = vmatprep.mubr.bf16.mxu0 %v1372_v0  ;;  %1076 = vmatmul.mubr.bf16.vlgmr.msra.gmra.mrb[0].mxu1 %v1421_v18 }
  0x6b   :  { %1079 = vmatprep.mubr.bf16.mxu1 %v1424_v19 }
  0x71   :  { %355 = vmatmul.mubr.bf16.gmra.mrb[20].mxu0 %v1433_v22 }
  0x72   :  { %364 = vmatprep.mubr.bf16.mxu0 %v1372_v0  ;;  %1080 = vmatmul.mubr.bf16.gmra.mrb[4].mxu1 %v1427_v20 }
  0x73   :  { %1083 = vmatprep.mubr.bf16.mxu1 %v1430_v21 }
  0x79   :  { %365 = vmatmul.mubr.bf16.gmra.mrb[24].mxu0 %v1436_v23 }
  0x7a   :  { %374 = vmatprep.mubr.bf16.mxu0 %v1372_v0  ;;  %1084 = vmatmul.mubr.bf16.gmra.mrb[8].mxu1 %v1433_v22 }
  0x7b   :  { %1087 = vmatprep.mubr.bf16.mxu1 %v1436_v23 }
  0x81   :  { %375 = vmatmul.mubr.bf16.gmra.mrb[28].mxu0 %v1439_v24 }
  0x82   :  { %1088 = vmatmul.mubr.bf16.gmra.mrb[12].mxu1 %v1439_v24 }
 0x11c   :  { %v306_v25 = vpop.f32.mrb[0].mxu0 }
 0x11d   :  { %v308_v26 = vpop.f32.mrb[1].mxu0 }
 0x11e   :  { %v310_v27 = vpop.f32.mrb[2].mxu0 }
 0x11f   :  { %v482_v28 = vpack.c.bf16 %v310_v27, %v306_v25  ;;  %v312_v29 = vpop.f32.mrb[3].mxu0  ;;  %v662_v25 = vand.u32 127, %v661_v17 }
 0x120   :  { %v483_v30 = vpack.c.bf16 %v312_v29, %v308_v26 }
 0x121   :  { %1091 = vmatprep.subr.bf16.mxu0 %v482_v28  ;;  %vm663_vm0 = vcmp.lt.s32.totalorder %v662_v25, 8 }
 0x122   :  { %1092 = vmatpush3.bf16.xpose.msra.mxu0 %v482_v28  ;;  %1107 = vmatprep.mubr.bf16.mxu0 %v483_v30 }
 0x124   :  { %v316_v31 = vpop.f32.mrb[4].mxu0 }
 0x125   :  { %v318_v32 = vpop.f32.mrb[5].mxu0 }
 0x126   :  { %v320_v33 = vpop.f32.mrb[6].mxu0 }
 0x127   :  { %v485_v34 = vpack.c.bf16 %v320_v33, %v316_v31  ;;  %v322_v35 = vpop.f32.mrb[7].mxu0 }
 0x128   :  { %v486_v36 = vpack.c.bf16 %v322_v35, %v318_v32 }
 0x129   :  { %1093 = vmatprep.subr.bf16.mxu0 %v485_v34 }
 0x12a   :  { %1094 = vmatpush3.bf16.xpose.msra.mxu0 %v485_v34 }
 0x12c   :  { %v326_v37 = vpop.f32.mrb[8].mxu0 }
 0x12d   :  { %v328_v38 = vpop.f32.mrb[9].mxu0 }
 0x12e   :  { %v330_v39 = vpop.f32.mrb[10].mxu0 }
 0x12f   :  { %v488_v40 = vpack.c.bf16 %v330_v39, %v326_v37  ;;  %v332_v41 = vpop.f32.mrb[11].mxu0 }
 0x130   :  { %v489_v42 = vpack.c.bf16 %v332_v41, %v328_v38 }
 0x131   :  { %1095 = vmatprep.subr.bf16.mxu0 %v488_v40 }
 0x132   :  { %1096 = vmatpush3.bf16.xpose.msra.mxu0 %v488_v40 }
 0x134   :  { %v336_v43 = vpop.f32.mrb[12].mxu0 }
 0x135   :  { %v338_v44 = vpop.f32.mrb[13].mxu0 }
 0x136   :  { %v340_v45 = vpop.f32.mrb[14].mxu0 }
 0x137   :  { %v491_v46 = vpack.c.bf16 %v340_v45, %v336_v43  ;;  %v342_v47 = vpop.f32.mrb[15].mxu0 }
 0x138   :  { %v492_v48 = vpack.c.bf16 %v342_v47, %v338_v44 }
 0x139   :  { %1097 = vmatprep.subr.bf16.mxu0 %v491_v46 }
 0x13a   :  { %1098 = vmatpush3.bf16.xpose.msra.mxu0 %v491_v46 }
 0x13c   :  { %v346_v49 = vpop.f32.mrb[16].mxu0 }
 0x13d   :  { %v348_v50 = vpop.f32.mrb[17].mxu0 }
 0x13e   :  { %v350_v51 = vpop.f32.mrb[18].mxu0 }
 0x13f   :  { %v494_v52 = vpack.c.bf16 %v350_v51, %v346_v49  ;;  %v352_v53 = vpop.f32.mrb[19].mxu0 }
 0x140   :  { %v495_v54 = vpack.c.bf16 %v352_v53, %v348_v50 }
 0x141   :  { %1099 = vmatprep.subr.bf16.mxu0 %v494_v52 }
 0x142   :  { %1100 = vmatpush3.bf16.xpose.msra.mxu0 %v494_v52 }
 0x144   :  { %v356_v55 = vpop.f32.mrb[20].mxu0 }
 0x145   :  { %v358_v56 = vpop.f32.mrb[21].mxu0 }
 0x146   :  { %v360_v57 = vpop.f32.mrb[22].mxu0 }
 0x147   :  { %v497_v58 = vpack.c.bf16 %v360_v57, %v356_v55  ;;  %v362_v59 = vpop.f32.mrb[23].mxu0 }
 0x148   :  { %v498_v60 = vpack.c.bf16 %v362_v59, %v358_v56 }
 0x149   :  { %1101 = vmatprep.subr.bf16.mxu0 %v497_v58 }
 0x14a   :  { %1102 = vmatpush3.bf16.xpose.msra.mxu0 %v497_v58 }
 0x14c   :  { %v366_v61 = vpop.f32.mrb[24].mxu0 }
 0x14d   :  { %v368_v62 = vpop.f32.mrb[25].mxu0 }
 0x14e   :  { %v370_v63 = vpop.f32.mrb[26].mxu0 }
 0x14f   :  { %v500_v0 = vpack.c.bf16 %v370_v63, %v366_v61  ;;  %v372_v1 = vpop.f32.mrb[27].mxu0  ;;  %v1077_v61 = vpop.f32.mrb[0].mxu1 }
 0x150   :  { %v501_v2 = vpack.c.bf16 %v372_v1, %v368_v62  ;;  %v419_v63 = vpop.f32.mrb[1].mxu1 }
 0x151   :  { %1103 = vmatprep.subr.bf16.mxu0 %v500_v0 }
 0x152   :  { %1104 = vmatpush3.bf16.xpose.msra.mxu0 %v500_v0 }
 0x154   :  { %v376_v3 = vpop.f32.mrb[28].mxu0 }
 0x155   :  { %v378_v4 = vpop.f32.mrb[29].mxu0 }
 0x156   :  { %v380_v5 = vpop.f32.mrb[30].mxu0 }
 0x157   :  { %v503_v6 = vpack.c.bf16 %v380_v5, %v376_v3  ;;  %v382_v7 = vpop.f32.mrb[31].mxu0 }
 0x158   :  { %v504_v8 = vpack.c.bf16 %v382_v7, %v378_v4 }
 0x159   :  { %1105 = vmatprep.subr.bf16.mxu0 %v503_v6 }
 0x15a   :  { %1106 = vmatpush3.bf16.xpose.msra.mxu0 %v503_v6 }
 0x161   :  { %1108 = vmatmul.mubr.bf16.vlgmr.msra.gmra.mrb[32].mxu0 %v486_v36 }
 0x162   :  { %1111 = vmatprep.mubr.bf16.mxu0 %v489_v42 }
 0x169   :  { %1112 = vmatmul.mubr.bf16.gmra.mrb[36].mxu0 %v492_v48 }
 0x16a   :  { %1115 = vmatprep.mubr.bf16.mxu0 %v495_v54 }
 0x171   :  { %1116 = vmatmul.mubr.bf16.gmra.mrb[40].mxu0 %v498_v60 }
 0x172   :  { %1119 = vmatprep.mubr.bf16.mxu0 %v501_v2  ;;  %v1078_v2 = vpop.f32.mrb[2].mxu1 }
 0x173   :  { %v487_v4 = vpack.c.bf16 %v1078_v2, %v1077_v61  ;;  %v422_v5 = vpop.f32.mrb[3].mxu1 }
 0x174   :  { %v484_v7 = vpack.c.bf16 %v422_v5, %v419_v63  ;;  %v1081_v14 = vpop.f32.mrb[4].mxu1 }
 0x175   :  { %v435_v25 = vpop.f32.mrb[5].mxu1 }
 0x176   :  { %1123 = vmatprep.subr.bf16.mxu1 %v484_v7 }
 0x177   :  { %1124 = vmatpush3.bf16.msra.mxu1 %v484_v7 }
 0x178   :  { %1125 = vmatprep.subr.bf16.mxu1 %v487_v4 }
 0x179   :  { %1120 = vmatmul.mubr.bf16.gmra.mrb[44].mxu0 %v504_v8 }
 0x17b   :  { %1126 = vmatpush3.bf16.msra.mxu1 %v487_v4 }
 0x234   :  { %v1109_v26 = vpop.f32.mrb[32].mxu0 }
 0x235   :  { %v594_v27 = vpop.f32.mrb[33].mxu0  ;;  %v666_v28 = vsel %vm663_vm0, %v1109_v26, -inf }
 0x236   :  { %660 = vst [vmem:[#allocation9 - $0x1] sm:$0x2] %v594_v27  ;;  %684 = vmax.xlane.f32.xlu1 %v666_v28  ;;  %v1110_v18 = vpop.f32.mrb[34].mxu0  ;;  %v664_v19 = vsel %vm663_vm0, %v594_v27, -inf  ;;  %v1082_v27 = vpop.f32.mrb[6].mxu1 }
 0x237   :  { %680 = vmax.xlane.f32.xlu0 %v664_v19  ;;  %v597_v20 = vpop.f32.mrb[35].mxu0  ;;  %v667_v21 = vsel %vm663_vm0, %v1110_v18, -inf }
 0x238   :  { %v665_v22 = vsel %vm663_vm0, %v597_v20, -inf  ;;  %v438_v20 = vpop.f32.mrb[7].mxu1 }
 0x23a   :  { %686 = vmax.xlane.f32.xlu1 %v667_v21 }
 0x23b   :  { %682 = vmax.xlane.f32.xlu0 %v665_v22 }
 0x23c   :  { %v1113_v23 = vpop.f32.mrb[36].mxu0 }
 0x23d   :  { %v610_v24 = vpop.f32.mrb[37].mxu0  ;;  %v1456_v33 = vsel %vm663_vm0, %v1113_v23, -inf  ;;  %v490_v23 = vpack.c.bf16 %v438_v20, %v435_v25 }
 0x23e   :  { %v1114_v29 = vpop.f32.mrb[38].mxu0  ;;  %v668_v30 = vsel %vm663_vm0, %v610_v24, -inf }
 0x23f   :  { %688 = vmax.xlane.f32.xlu0 %v668_v30  ;;  %v613_v31 = vpop.f32.mrb[39].mxu0  ;;  %v1460_v35 = vsel %vm663_vm0, %v1114_v29, -inf  ;;  %1127 = vmatprep.subr.bf16.mxu1 %v490_v23 }
 0x240   :  { %v669_v32 = vsel %vm663_vm0, %v613_v31, -inf  ;;  %1128 = vmatpush3.bf16.msra.mxu1 %v490_v23 }
 0x241   :  { %690 = vmax.xlane.f32.xlu1 %v669_v32 }
 0x243   :  { %692 = vmax.xlane.f32.xlu0 %v1456_v33 }
 0x244   :  { %v1117_v34 = vpop.f32.mrb[40].mxu0 }
 0x245   :  { %694 = vmax.xlane.f32.xlu1 %v1460_v35  ;;  %v626_v36 = vpop.f32.mrb[41].mxu0  ;;  %v1472_v41 = vsel %vm663_vm0, %v1117_v34, -inf }
 0x246   :  { %v1118_v37 = vpop.f32.mrb[42].mxu0  ;;  %v1464_v38 = vsel %vm663_vm0, %v626_v36, -inf  ;;  %v1085_v36 = vpop.f32.mrb[8].mxu1 }
 0x247   :  { %696 = vmax.xlane.f32.xlu0 %v1464_v38  ;;  %v629_v39 = vpop.f32.mrb[43].mxu0  ;;  %v1476_v43 = vsel %vm663_vm0, %v1118_v37, -inf }
 0x248   :  { %v1468_v40 = vsel %vm663_vm0, %v629_v39, -inf }
 0x249   :  { %698 = vmax.xlane.f32.xlu1 %v1468_v40 }
 0x24b   :  { %700 = vmax.xlane.f32.xlu0 %v1472_v41 }
 0x24c   :  { %v1121_v42 = vpop.f32.mrb[44].mxu0 }
 0x24d   :  { %702 = vmax.xlane.f32.xlu1 %v1476_v43  ;;  %v642_v44 = vpop.f32.mrb[45].mxu0  ;;  %v1488_v49 = vsel %vm663_vm0, %v1121_v42, -inf }
 0x24e   :  { %v1122_v45 = vpop.f32.mrb[46].mxu0  ;;  %v1480_v46 = vsel %vm663_vm0, %v642_v44, -inf }
 0x24f   :  { %704 = vmax.xlane.f32.xlu0 %v1480_v46  ;;  %v645_v47 = vpop.f32.mrb[47].mxu0  ;;  %v1492_v50 = vsel %vm663_vm0, %v1122_v45, -inf }
 0x250   :  { %v1484_v48 = vsel %vm663_vm0, %v645_v47, -inf }
 0x251   :  { %706 = vmax.xlane.f32.xlu1 %v1484_v48 }
 0x253   :  { %708 = vmax.xlane.f32.xlu0 %v1488_v49 }
 0x255   :  { %710 = vmax.xlane.f32.xlu1 %v1492_v50 }
 0x2c3   :  { %v685_v51 = vpop.xlane.xlu1 %684 }
 0x2c4   :  { %v714_v52 = vsub.f32 %v666_v28, %v685_v51  ;;  %v681_v53 = vpop.xlane.xlu0 %680 }
 0x2c5   :  { %v712_v54 = vsub.f32 %v664_v19, %v681_v53  ;;  %v493_v19 = vpack.c.bf16 %v1082_v27, %v1081_v14 }
 0x2c6   :  { %v732_v57 = vmul.f32 1.442695, %v714_v52 }
 0x2c7   :  { %v728_v55 = vmul.f32 1.442695, %v712_v54  ;;  %v687_v56 = vpop.xlane.xlu1 %686  ;;  %1129 = vmatprep.subr.bf16.mxu1 %v493_v19 }
 0x2c8   :  { %v715_v58 = vsub.f32 %v667_v21, %v687_v56  ;;  %v683_v59 = vpop.xlane.xlu0 %682  ;;  %1130 = vmatpush3.bf16.msra.mxu1 %v493_v19 }
 0x2c9   :  { %1206 = vpow2.f32 %v728_v55  ;;  %v713_v60 = vsub.f32 %v665_v22, %v683_v59 }
 0x2ca   :  { %1208 = vpow2.f32 %v732_v57  ;;  %v734_v0 = vmul.f32 1.442695, %v715_v58 }
 0x2cb   :  { %v730_v62 = vmul.f32 1.442695, %v713_v60 }
 0x2cc   :  { %v689_v1 = vpop.xlane.xlu0 %688 }
 0x2cd   :  { %1210 = vpow2.f32 %v730_v62  ;;  %v716_v3 = vsub.f32 %v668_v30, %v689_v1 }
 0x2ce   :  { %v691_v6 = vpop.xlane.xlu1 %690  ;;  %1212 = vpow2.f32 %v734_v0 }
 0x2cf   :  { %v736_v8 = vmul.f32 1.442695, %v716_v3  ;;  %v717_v9 = vsub.f32 %v669_v32, %v691_v6 }
 0x2d0   :  { %v693_v10 = vpop.xlane.xlu0 %692 }
 0x2d1   :  { %1214 = vpow2.f32 %v736_v8  ;;  %v738_v11 = vmul.f32 1.442695, %v717_v9  ;;  %v718_v12 = vsub.f32 %v1456_v33, %v693_v10 }
 0x2d2   :  { %v695_v13 = vpop.xlane.xlu1 %694 }
 0x2d3   :  { %v1496_v15 = vpop.eup %1206  ;;  %v740_v16 = vmul.f32 1.442695, %v718_v12  ;;  %v719_v17 = vsub.f32 %v1460_v35, %v695_v13  ;;  %1216 = vpow2.f32 %v738_v11 }
 0x2d4   :  { %v697_v26 = vpop.xlane.xlu0 %696  ;;  %760 = vadd.xlane.f32.xlu0 %v1496_v15  ;;  %v1501_v21 = vpop.eup %1208 }
 0x2d5   :  { %1218 = vpow2.f32 %v740_v16  ;;  %v742_v28 = vmul.f32 1.442695, %v719_v17  ;;  %v720_v18 = vsub.f32 %v1464_v38, %v697_v26 }
 0x2d6   :  { %v699_v22 = vpop.xlane.xlu1 %698 }
 0x2d7   :  { %v1503_v24 = vpop.eup %1210  ;;  %v744_v29 = vmul.f32 1.442695, %v720_v18  ;;  %v721_v30 = vsub.f32 %v1468_v40, %v699_v22  ;;  %1220 = vpow2.f32 %v742_v28  ;;  %v451_v40 = vpop.f32.mrb[9].mxu1 }
 0x2d8   :  { %v701_v31 = vpop.xlane.xlu0 %700  ;;  %764 = vadd.xlane.f32.xlu0 %v1501_v21  ;;  %762 = vadd.xlane.f32.xlu1 %v1503_v24  ;;  %v1509_v34 = vpop.eup %1212 }
 0x2d9   :  { %1222 = vpow2.f32 %v744_v29  ;;  %v746_v32 = vmul.f32 1.442695, %v721_v30  ;;  %v722_v33 = vsub.f32 %v1472_v41, %v701_v31  ;;  %v1086_v41 = vpop.f32.mrb[10].mxu1 }
 0x2da   :  { %v703_v35 = vpop.xlane.xlu1 %702  ;;  %v499_v47 = vpack.c.bf16 %v1086_v41, %v1085_v36  ;;  %v454_v51 = vpop.f32.mrb[11].mxu1 }
 0x2db   :  { %v1511_v37 = vpop.eup %1214  ;;  %v748_v38 = vmul.f32 1.442695, %v722_v33  ;;  %v723_v39 = vsub.f32 %v1476_v43, %v703_v35  ;;  %1224 = vpow2.f32 %v746_v32  ;;  %v496_v54 = vpack.c.bf16 %v454_v51, %v451_v40  ;;  %v1089_v61 = vpop.f32.mrb[12].mxu1 }
 0x2dc   :  { %768 = vadd.xlane.f32.xlu0 %v1511_v37  ;;  %v705_v42 = vpop.xlane.xlu0 %704  ;;  %766 = vadd.xlane.f32.xlu1 %v1509_v34  ;;  %v467_v0 = vpop.f32.mrb[13].mxu1 }
 0x2dd   :  { %1226 = vpow2.f32 %v748_v38  ;;  %v750_v44 = vmul.f32 1.442695, %v723_v39  ;;  %v724_v45 = vsub.f32 %v1480_v46, %v705_v42  ;;  %v1517_v52 = vpop.eup %1216  ;;  %1131 = vmatprep.subr.bf16.mxu1 %v496_v54  ;;  %v1090_v1 = vpop.f32.mrb[14].mxu1 }
 0x2de   :  { %v707_v53 = vpop.xlane.xlu1 %706  ;;  %1132 = vmatpush3.bf16.msra.mxu1 %v496_v54  ;;  %v505_v2 = vpack.c.bf16 %v1090_v1, %v1089_v61  ;;  %v470_v5 = vpop.f32.mrb[15].mxu1 }
 0x2df   :  { %v1519_v43 = vpop.eup %1218  ;;  %v752_v55 = vmul.f32 1.442695, %v724_v45  ;;  %v725_v56 = vsub.f32 %v1484_v48, %v707_v53  ;;  %1228 = vpow2.f32 %v750_v44  ;;  %1133 = vmatprep.subr.bf16.mxu1 %v499_v47 }
 0x2e0   :  { %772 = vadd.xlane.f32.xlu0 %v1519_v43  ;;  %v709_v57 = vpop.xlane.xlu0 %708  ;;  %770 = vadd.xlane.f32.xlu1 %v1517_v52 }
 0x2e1   :  { %1230 = vpow2.f32 %v752_v55  ;;  %v754_v46 = vmul.f32 1.442695, %v725_v56  ;;  %v726_v58 = vsub.f32 %v1488_v49, %v709_v57  ;;  %v1525_v59 = vpop.eup %1220 }
 0x2e2   :  { %v711_v60 = vpop.xlane.xlu1 %710  ;;  %1134 = vmatpush3.bf16.msra.mxu1 %v499_v47 }
 0x2e3   :  { %v1527_v62 = vpop.eup %1222  ;;  %v756_v63 = vmul.f32 1.442695, %v726_v58  ;;  %v727_v48 = vsub.f32 %v1492_v50, %v711_v60  ;;  %1232 = vpow2.f32 %v754_v46  ;;  %v502_v50 = vpack.c.bf16 %v470_v5, %v467_v0 }
 0x2e4   :  { %776 = vadd.xlane.f32.xlu0 %v1527_v62  ;;  %774 = vadd.xlane.f32.xlu1 %v1525_v59 }
 0x2e5   :  { %1234 = vpow2.f32 %v756_v63  ;;  %v758_v49 = vmul.f32 1.442695, %v727_v48  ;;  %v1532_v3 = vpop.eup %1224  ;;  %1135 = vmatprep.subr.bf16.mxu1 %v502_v50 }
 0x2e6   :  { %1136 = vmatpush3.bf16.msra.mxu1 %v502_v50 }
 0x2e7   :  { %v1534_v4 = vpop.eup %1226  ;;  %1236 = vpow2.f32 %v758_v49  ;;  %1137 = vmatprep.subr.bf16.mxu1 %v505_v2 }
 0x2e8   :  { %780 = vadd.xlane.f32.xlu0 %v1534_v4  ;;  %778 = vadd.xlane.f32.xlu1 %v1532_v3 }
 0x2e9   :  { %v1538_v6 = vpop.eup %1228 }
 0x2ea   :  { %1138 = vmatpush3.bf16.msra.mxu1 %v505_v2 }
 0x2eb   :  { %v1540_v7 = vpop.eup %1230 }
 0x2ec   :  { %784 = vadd.xlane.f32.xlu0 %v1540_v7  ;;  %782 = vadd.xlane.f32.xlu1 %v1538_v6 }
 0x2ed   :  { %v1544_v8 = vpop.eup %1232 }
 0x2ef   :  { %v1546_v9 = vpop.eup %1234 }
 0x2f0   :  { %788 = vadd.xlane.f32.xlu0 %v1546_v9  ;;  %786 = vadd.xlane.f32.xlu1 %v1544_v8 }
 0x2f1   :  { %v1550_v10 = vpop.eup %1236 }
 0x2f4   :  { %790 = vadd.xlane.f32.xlu1 %v1550_v10 }
 0x361   :  { %v761_v11 = vpop.xlane.xlu0 %760 }
 0x362   :  { %1238 = vrcp.f32 %v761_v11 }
 0x365   :  { %v765_v12 = vpop.xlane.xlu0 %764  ;;  %v763_v13 = vpop.xlane.xlu1 %762 }
 0x366   :  { %1240 = vrcp.f32 %v763_v13 }
 0x367   :  { %1242 = vrcp.f32 %v765_v12 }
 0x369   :  { %v769_v14 = vpop.xlane.xlu0 %768  ;;  %v767_v16 = vpop.xlane.xlu1 %766 }
 0x36a   :  { %1244 = vrcp.f32 %v767_v16 }
 0x36b   :  { %1246 = vrcp.f32 %v769_v14 }
 0x36c   :  { %v1239_v26 = vpop.eup %1238 }
 0x36d   :  { %v773_v17 = vpop.xlane.xlu0 %772  ;;  %v771_v25 = vpop.xlane.xlu1 %770  ;;  %v808_v19 = vmul.f32 %v1239_v26, %v1496_v15 }
 0x36e   :  { %1248 = vrcp.f32 %v771_v25 }
 0x36f   :  { %1250 = vrcp.f32 %v773_v17 }
 0x370   :  { %v1241_v27 = vpop.eup %1240 }
 0x371   :  { %v777_v28 = vpop.xlane.xlu0 %776  ;;  %v775_v18 = vpop.xlane.xlu1 %774  ;;  %v809_v20 = vmul.f32 %v1241_v27, %v1503_v24 }
 0x372   :  { %v1243_v22 = vpop.eup %1242  ;;  %1252 = vrcp.f32 %v775_v18 }
 0x373   :  { %v824_v23 = vpack.c.bf16 %v809_v20, %v808_v19  ;;  %1254 = vrcp.f32 %v777_v28  ;;  %v810_v32 = vmul.f32 %v1243_v22, %v1501_v21 }
 0x374   :  { %v1245_v29 = vpop.eup %1244 }
 0x375   :  { %v781_v30 = vpop.xlane.xlu0 %780  ;;  %v779_v31 = vpop.xlane.xlu1 %778  ;;  %v811_v33 = vmul.f32 %v1245_v29, %v1509_v34  ;;  %1139 = vmatprep.mubr.bf16.mxu1 %v824_v23 }
 0x376   :  { %v1247_v35 = vpop.eup %1246  ;;  %1256 = vrcp.f32 %v779_v31 }
 0x377   :  { %v825_v36 = vpack.c.bf16 %v811_v33, %v810_v32  ;;  %1258 = vrcp.f32 %v781_v30  ;;  %v812_v24 = vmul.f32 %v1247_v35, %v1511_v37 }
 0x378   :  { %v1249_v38 = vpop.eup %1248 }
 0x379   :  { %v785_v15 = vpop.xlane.xlu0 %784  ;;  %v783_v39 = vpop.xlane.xlu1 %782  ;;  %1140 = vmatmul.mubr.bf16.vlgmr.msra.gmra.mrb[16].mxu1 %v825_v36  ;;  %v813_v40 = vmul.f32 %v1249_v38, %v1517_v52 }
 0x37a   :  { %v1251_v42 = vpop.eup %1250  ;;  %1260 = vrcp.f32 %v783_v39 }
 0x37b   :  { %v826_v41 = vpack.c.bf16 %v813_v40, %v812_v24  ;;  %1262 = vrcp.f32 %v785_v15  ;;  %v814_v45 = vmul.f32 %v1251_v42, %v1519_v43 }
 0x37c   :  { %v1253_v44 = vpop.eup %1252 }
 0x37d   :  { %v789_v21 = vpop.xlane.xlu0 %788  ;;  %v787_v34 = vpop.xlane.xlu1 %786  ;;  %1143 = vmatprep.mubr.bf16.mxu1 %v826_v41  ;;  %v815_v47 = vmul.f32 %v1253_v44, %v1525_v59 }
 0x37e   :  { %v1255_v51 = vpop.eup %1254  ;;  %1264 = vrcp.f32 %v787_v34 }
 0x37f   :  { %1266 = vrcp.f32 %v789_v21  ;;  %v827_v53 = vpack.c.bf16 %v815_v47, %v814_v45  ;;  %v816_v52 = vmul.f32 %v1255_v51, %v1527_v62 }
 0x380   :  { %v1257_v54 = vpop.eup %1256 }
 0x381   :  { %v791_v37 = vpop.xlane.xlu1 %790  ;;  %1144 = vmatmul.mubr.bf16.gmra.mrb[20].mxu1 %v827_v53  ;;  %v817_v55 = vmul.f32 %v1257_v54, %v1532_v3  ;;  %v1259_v56 = vpop.eup %1258 }
 0x382   :  { %1268 = vrcp.f32 %v791_v37  ;;  %v818_v43 = vmul.f32 %v1259_v56, %v1534_v4 }
 0x383   :  { %v828_v57 = vpack.c.bf16 %v817_v55, %v816_v52 }
 0x384   :  { %v1261_v46 = vpop.eup %1260 }
 0x385   :  { %1147 = vmatprep.mubr.bf16.mxu1 %v828_v57  ;;  %v819_v58 = vmul.f32 %v1261_v46, %v1538_v6  ;;  %v1263_v59 = vpop.eup %1262 }
 0x386   :  { %v820_v48 = vmul.f32 %v1263_v59, %v1540_v7 }
 0x387   :  { %v829_v60 = vpack.c.bf16 %v819_v58, %v818_v43 }
 0x388   :  { %v1265_v61 = vpop.eup %1264 }
 0x389   :  { %v1267_v63 = vpop.eup %1266  ;;  %1148 = vmatmul.mubr.bf16.gmra.mrb[24].mxu1 %v829_v60  ;;  %v821_v0 = vmul.f32 %v1265_v61, %v1544_v8 }
 0x38a   :  { %v822_v49 = vmul.f32 %v1267_v63, %v1546_v9 }
 0x38b   :  { %v830_v1 = vpack.c.bf16 %v821_v0, %v820_v48 }
 0x38c   :  { %v1269_v62 = vpop.eup %1268 }
 0x38d   :  { %v823_v2 = vmul.f32 %v1269_v62, %v1550_v10  ;;  %1151 = vmatprep.mubr.bf16.mxu1 %v830_v1 }
 0x38f   :  { %v831_v3 = vpack.c.bf16 %v823_v2, %v822_v49 }
 0x391   :  { %1152 = vmatmul.mubr.bf16.gmra.mrb[28].mxu1 %v831_v3 }
 0x392   :  { %1325 = shalt.err (!%p1322_p6)
}
 0x393   :  { %s1326_s17 = scalar_lea.hbm %s1596_s3, 16 }
 0x394   :  { %p1327_p7 = scmp.ne.s32.totalorder %s1596_s3, %s1326_s17  ;;  %p1330_p8 = scmp.lt.u32.totalorder %s1326_s17, %s1596_s3 }
 0x396   :  { %p1332_p9 = pnand %p1330_p8, %p1327_p7 }
 0x398   :  { %1335 = shalt.err (!%p1332_p9)
}
 0x399   :  { %966 = dma.vmem_to_hbm [thread:$0]  %s964_s12, 16, %s1596_s3, [#allocation10]  }
 0x39a   :  { %s1374_s3 = smov [#allocation8]  }
 0x39b   :  { %s950_s24 = sshll.u32 %s1374_s3, 4  ;;  %s951_s24 = int_to_ptr.vmem [resolvable:$true] %s950_s24 }
 0x39c   :  { %s1336_s25 = scalar_lea.vmem %s951_s24, 2048  ;;  %p1341_p11 = scmp.lt.s32.totalorder %s951_s24, %s951_s24 }
 0x39d   :  { %p1337_p10 = scmp.ne.s32.totalorder %s951_s24, %s1336_s25  ;;  %p1342_p12 = scmp.lt.s32.totalorder %s1336_s25, %s1336_s25 }
 0x39f   :  { %p1343_p13 = por %p1342_p12, %p1341_p11 }
 0x3a1   :  { %p1344_p0 = pnand %p1343_p13, %p1337_p10 }
 0x44c   :  { %v1141_v4 = vpop.f32.mrb[16].mxu1 }
 0x44d   :  { %931 = vst [vmem:[#allocation8 + $0x10] sm:$0xff] %v1141_v4  ;;  %v866_v5 = vpop.f32.mrb[17].mxu1 }
 0x44e   :  { %929 = vst [vmem:[#allocation8] sm:$0xff] %v866_v5  ;;  %v1142_v50 = vpop.f32.mrb[18].mxu1 }
 0x44f   :  { %932 = vst [vmem:[#allocation8 + $0x18] sm:$0xff] %v1142_v50  ;;  %v869_v6 = vpop.f32.mrb[19].mxu1 }
 0x450   :  { %930 = vst [vmem:[#allocation8 + $0x8] sm:$0xff] %v869_v6 }
 0x454   :  { %v1145_v7 = vpop.f32.mrb[20].mxu1 }
 0x455   :  { %935 = vst [vmem:[#allocation8 + $0x30] sm:$0xff] %v1145_v7  ;;  %v882_v8 = vpop.f32.mrb[21].mxu1 }
 0x456   :  { %933 = vst [vmem:[#allocation8 + $0x20] sm:$0xff] %v882_v8  ;;  %v1146_v9 = vpop.f32.mrb[22].mxu1 }
 0x457   :  { %936 = vst [vmem:[#allocation8 + $0x38] sm:$0xff] %v1146_v9  ;;  %v885_v10 = vpop.f32.mrb[23].mxu1 }
 0x458   :  { %934 = vst [vmem:[#allocation8 + $0x28] sm:$0xff] %v885_v10 }
 0x45c   :  { %v1149_v11 = vpop.f32.mrb[24].mxu1 }
 0x45d   :  { %939 = vst [vmem:[#allocation8 + $0x50] sm:$0xff] %v1149_v11  ;;  %v898_v12 = vpop.f32.mrb[25].mxu1 }
 0x45e   :  { %937 = vst [vmem:[#allocation8 + $0x40] sm:$0xff] %v898_v12  ;;  %v1150_v13 = vpop.f32.mrb[26].mxu1 }
 0x45f   :  { %940 = vst [vmem:[#allocation8 + $0x58] sm:$0xff] %v1150_v13  ;;  %v901_v14 = vpop.f32.mrb[27].mxu1 }
 0x460   :  { %938 = vst [vmem:[#allocation8 + $0x48] sm:$0xff] %v901_v14 }
 0x464   :  { %v1153_v16 = vpop.f32.mrb[28].mxu1 }
 0x465   :  { %943 = vst [vmem:[#allocation8 + $0x70] sm:$0xff] %v1153_v16  ;;  %v914_v17 = vpop.f32.mrb[29].mxu1 }
 0x466   :  { %941 = vst [vmem:[#allocation8 + $0x60] sm:$0xff] %v914_v17  ;;  %v1154_v25 = vpop.f32.mrb[30].mxu1 }
 0x467   :  { %944 = vst [vmem:[#allocation8 + $0x78] sm:$0xff] %v1154_v25  ;;  %v917_v26 = vpop.f32.mrb[31].mxu1 }
 0x468   :  { %942 = vst [vmem:[#allocation8 + $0x68] sm:$0xff] %v917_v26 }
 0x469   :  { %1347 = shalt.err (!%p1344_p0)
}
 0x46a   :  { %s1348_s28 = scalar_lea.hbm %s1595_s2, 2048 }
 0x46b   :  { %p1349_p1 = scmp.ne.s32.totalorder %s1595_s2, %s1348_s28  ;;  %p1352_p2 = scmp.lt.u32.totalorder %s1348_s28, %s1595_s2 }
 0x46d   :  { %p1354_p3 = pnand %p1352_p2, %p1349_p1 }
 0x46f   :  { %1357 = shalt.err (!%p1354_p3)
}
 0x470   :  { %s1375_s6 = smov 128   ;;  %s1376_s7 = smov 8  }
 0x471   :  { %956 = dma.vmem_to_hbm [thread:$0]  %s951_s24, 2048, %s1595_s2, [#allocation5], %s1375_s6, %s1375_s6, %s1376_s7  }
 0x472   :  { %1362 = dma.done.wait [#allocation5], 2048  }
 0x473   :  { %1363 = vsyncadd [#allocation5], 4294965248 }
 0x474   :  { %1364 = dma.done.wait [#allocation10], 16  }
 0x475   :  { %1365 = vsyncadd [#allocation10], 4294967280 }
 0x476   :  { %973 = vsyncpa [#allocation4], 1 }
 0x477   :  { %974 = vsyncpa [#allocation7], 1 }
 0x478   :  { %975 = vsyncpa [#allocation5], 1 }
 0x479   :  { %976 = vsyncpa [#allocation10], 1 }

</bundles_post_ra>
